<compile_context>
chip_gen: v7x
topology: tpu7x:2x2x1
jax: 0.10.0
libtpu: 0.0.40
codegen_flags: <defaults>
</compile_context>

<pallas_src>
import functools

import jax
import jax.numpy as jnp
from jax.experimental import pallas as pl
from jax.experimental.pallas import tpu as pltpu

IN_FEATURES = 28 * 28        # 784
K_PAD = 896                  # 784 rounded up to a multiple of 128 (7 * 128)
HIDDEN = 128


def _round_up(n, m):
    return ((n + m - 1) // m) * m


def densenet_kernel(x_ref, w1_ref, b1_ref, w2_ref, b2_ref, w3_ref, b3_ref,
                    o_ref):
    # layer 1: linear + relu  (dropout1 = identity in eval mode)
    h = jnp.dot(x_ref[...], w1_ref[...], preferred_element_type=jnp.float32)
    h = jnp.maximum(h + b1_ref[...].astype(jnp.float32), 0.0)

    # layer 2: linear + relu  (dropout2 = identity in eval mode)
    h = jnp.dot(h.astype(w2_ref.dtype), w2_ref[...],
                preferred_element_type=jnp.float32)
    h = jnp.maximum(h + b2_ref[...].astype(jnp.float32), 0.0)

    # layer 3: linear
    logits = jnp.dot(h.astype(w3_ref.dtype), w3_ref[...],
                     preferred_element_type=jnp.float32)
    logits = logits + b3_ref[...].astype(jnp.float32)

    # log_softmax over dim=1 (feature axis), numerically stable
    m = jnp.max(logits, axis=1, keepdims=True)
    shifted = logits - m
    lse = jnp.log(jnp.sum(jnp.exp(shifted), axis=1, keepdims=True))
    o_ref[...] = (shifted - lse).astype(o_ref.dtype)


def prepare_input(x):
    """One-time preprocessing: flatten (B,1,28,28) -> (B,784), zero-pad K to 896.

    In production this should be applied once in the data pipeline, not per
    step, so the kernel's x @ w1 sees clean (.,128) lane tiling for free.
    """
    B = x.shape[0]
    x2d = x.reshape(B, -1)
    assert x2d.shape[1] == IN_FEATURES
    return jnp.pad(x2d, ((0, 0), (0, K_PAD - IN_FEATURES)))


@functools.partial(jax.jit, static_argnames=("block_b",))
def densenet_forward(xp, params, block_b=512):
    """xp: (B, 896) pre-flattened, K-padded input (see prepare_input).

    Returns (B, 128) log-probabilities (float32).
    """
    w1, b1, w2, b2, w3, b3 = params
    B, K = xp.shape
    assert K == K_PAD and w1.shape[0] == K_PAD

    # Batch tiling: big tiles (default 512 rows, a multiple of 128), clamped
    # for small batches (multiple of 8 sublanes), batch padded to whole tiles.
    block_b_eff = min(block_b, _round_up(B, 8))
    B_pad = _round_up(B, block_b_eff)
    if B_pad != B:
        xp = jnp.pad(xp, ((0, B_pad - B), (0, 0)))
    grid = (B_pad // block_b_eff,)

    # Grid-invariant weights/biases: full blocks, single-buffered (their block
    # index never moves, so double-buffering would only burn VMEM).
    def resident(shape):
        return pl.BlockSpec(shape, lambda i: (0, 0),
                            pipeline_mode=pl.Buffered(1))

    x_itemsize = jnp.dtype(xp.dtype).itemsize
    param_bytes = sum(int(p.size) * jnp.dtype(p.dtype).itemsize
                      for p in (w1, b1, w2, b2, w3, b3))
    cost = pl.CostEstimate(
        flops=2 * B_pad * (K_PAD * HIDDEN + 2 * HIDDEN * HIDDEN)
        + 6 * B_pad * HIDDEN,
        transcendentals=B_pad * HIDDEN,
        bytes_accessed=B_pad * K_PAD * x_itemsize
        + B_pad * HIDDEN * 4 + param_bytes,
    )

    out = pl.pallas_call(
        densenet_kernel,
        out_shape=jax.ShapeDtypeStruct((B_pad, HIDDEN), jnp.float32),
        grid_spec=pltpu.PrefetchScalarGridSpec(
            num_scalar_prefetch=0,
            grid=grid,
            in_specs=[
                pl.BlockSpec((block_b_eff, K_PAD), lambda i: (i, 0)),  # x tile
                resident((K_PAD, HIDDEN)),    # w1
                resident((1, HIDDEN)),        # b1
                resident((HIDDEN, HIDDEN)),   # w2
                resident((1, HIDDEN)),        # b2
                resident((HIDDEN, HIDDEN)),   # w3
                resident((1, HIDDEN)),        # b3
            ],
            out_specs=pl.BlockSpec((block_b_eff, HIDDEN), lambda i: (i, 0)),
        ),
        compiler_params=pltpu.CompilerParams(
            dimension_semantics=("parallel",),
            # Headroom for block_b up to a few thousand rows while staying
            # inside every generation's physical VMEM (v7x: 64 MiB per TC).
            vmem_limit_bytes=64 * 1024 * 1024,
        ),
        cost_estimate=cost,
    )(xp, w1, b1, w2, b2, w3, b3)

    return out[:B]


def init_params(key, dtype=jnp.float32):
    """nn.Linear-style uniform(-1/sqrt(fan_in), +bound) init.

    Weights are stored transposed, (in_features, out_features); w1 is K-padded
    with zero rows so x_padded @ w1 == x @ w1_unpadded exactly.
    Pass dtype=jnp.bfloat16 to halve HBM traffic on v6e/v7x (accumulation in
    the kernel remains float32).
    """
    ks = jax.random.split(key, 6)

    def linear(kw, kb, fan_in, fan_out, pad_to=None):
        bound = 1.0 / jnp.sqrt(jnp.float32(fan_in))
        w = jax.random.uniform(kw, (fan_in, fan_out), jnp.float32,
                               -bound, bound)
        b = jax.random.uniform(kb, (1, fan_out), jnp.float32, -bound, bound)
        if pad_to is not None and pad_to > fan_in:
            w = jnp.pad(w, ((0, pad_to - fan_in), (0, 0)))
        return w.astype(dtype), b.astype(dtype)

    w1, b1 = linear(ks[0], ks[1], IN_FEATURES, HIDDEN, pad_to=K_PAD)
    w2, b2 = linear(ks[2], ks[3], HIDDEN, HIDDEN)
    w3, b3 = linear(ks[4], ks[5], HIDDEN, HIDDEN)
    return (w1, b1, w2, b2, w3, b3)


def reference_forward(xp, params):
    """Plain-JAX reference (takes the same K-padded input as the kernel)."""
    w1, b1, w2, b2, w3, b3 = params
    f32 = jnp.float32
    h = jnp.maximum(xp.astype(f32) @ w1.astype(f32) + b1.astype(f32), 0.0)
    h = jnp.maximum(h @ w2.astype(f32) + b2.astype(f32), 0.0)
    logits = h @ w3.astype(f32) + b3.astype(f32)
    return jax.nn.log_softmax(logits, axis=1)


if __name__ == "__main__":
    key = jax.random.PRNGKey(0)
    kx, kp = jax.random.split(key)

    params = init_params(kp)

    # Small deterministic test batch (MNIST-shaped input).
    B = 8
    x = jax.random.normal(kx, (B, 1, 28, 28), jnp.float32)
    xp = prepare_input(x)

    out = jax.block_until_ready(densenet_forward(xp, params))
    ref = reference_forward(xp, params)
    assert out.shape == (B, HIDDEN)
    assert jnp.allclose(out, ref, atol=1e-5, rtol=1e-5)
    # log_softmax rows must sum to 1 in probability space
    assert jnp.allclose(jnp.sum(jnp.exp(out), axis=1), 1.0, atol=1e-5)

    # Ragged batch: exercises the batch-padding / remainder-tile path.
    B2 = 12
    x2 = jax.random.normal(kx, (B2, 1, 28, 28), jnp.float32)
    xp2 = prepare_input(x2)
    out2 = jax.block_until_ready(densenet_forward(xp2, params))
    ref2 = reference_forward(xp2, params)
    assert out2.shape == (B2, HIDDEN)
    assert jnp.allclose(out2, ref2, atol=1e-5, rtol=1e-5)

    print("KERNEL_OK")
</pallas_src>

<mosaic_0001>
module attributes {stable_mosaic.version = 11 : i64} {
  func.func @densenet_kernel(%arg0: i32, %arg1: memref<8x896xf32, #tpu.memory_space<vmem>>, %arg2: memref<896x128xf32, #tpu.memory_space<vmem>>, %arg3: memref<1x128xf32, #tpu.memory_space<vmem>>, %arg4: memref<128x128xf32, #tpu.memory_space<vmem>>, %arg5: memref<1x128xf32, #tpu.memory_space<vmem>>, %arg6: memref<128x128xf32, #tpu.memory_space<vmem>>, %arg7: memref<1x128xf32, #tpu.memory_space<vmem>>, %arg8: memref<8x128xf32, #tpu.memory_space<vmem>>) attributes {dimension_semantics = [#tpu.dimension_semantics<parallel>], iteration_bounds = array<i64: 1>, scalar_prefetch = 0 : i64, scratch_operands = 0 : i64, tpu.core_type = #tpu.core_type<tc>, window_params = [{transform_indices = @transform_0, window_bounds = array<i64: 8, 896>}, {pipeline_mode = #tpu.pipeline_mode<synchronous>, transform_indices = @transform_1, window_bounds = array<i64: 896, 128>}, {pipeline_mode = #tpu.pipeline_mode<synchronous>, transform_indices = @transform_2, window_bounds = array<i64: 1, 128>}, {pipeline_mode = #tpu.pipeline_mode<synchronous>, transform_indices = @transform_3, window_bounds = array<i64: 128, 128>}, {pipeline_mode = #tpu.pipeline_mode<synchronous>, transform_indices = @transform_4, window_bounds = array<i64: 1, 128>}, {pipeline_mode = #tpu.pipeline_mode<synchronous>, transform_indices = @transform_5, window_bounds = array<i64: 128, 128>}, {pipeline_mode = #tpu.pipeline_mode<synchronous>, transform_indices = @transform_6, window_bounds = array<i64: 1, 128>}, {transform_indices = @transform_7, window_bounds = array<i64: 8, 128>}]} {
    %c0 = arith.constant 0 : index
    %c0_0 = arith.constant 0 : index
    %0 = vector.load %arg1[%c0, %c0_0] : memref<8x896xf32, #tpu.memory_space<vmem>>, vector<8x896xf32>
    %c0_1 = arith.constant 0 : index
    %c0_2 = arith.constant 0 : index
    %1 = vector.load %arg2[%c0_1, %c0_2] : memref<896x128xf32, #tpu.memory_space<vmem>>, vector<896x128xf32>
    %cst = arith.constant dense<0.000000e+00> : vector<8x128xf32>
    %2 = tpu.matmul %0, %1, %cst {dimension_numbers = #tpu.dot_dimension_numbers<[1], [0], [0], [1], [0, 0, 1, 1], [], []>} : vector<8x896xf32>, vector<896x128xf32>, vector<8x128xf32> -> vector<8x128xf32>
    %c0_3 = arith.constant 0 : index
    %c0_4 = arith.constant 0 : index
    %3 = vector.load %arg3[%c0_3, %c0_4] : memref<1x128xf32, #tpu.memory_space<vmem>>, vector<1x128xf32>
    %4 = vector.broadcast %3 : vector<1x128xf32> to vector<8x128xf32>
    %5 = arith.addf %2, %4 : vector<8x128xf32>
    %cst_5 = arith.constant 0.000000e+00 : f32
    %6 = vector.broadcast %cst_5 : f32 to vector<8x128xf32>
    %7 = arith.maximumf %5, %6 : vector<8x128xf32>
    %c0_6 = arith.constant 0 : index
    %c0_7 = arith.constant 0 : index
    %8 = vector.load %arg4[%c0_6, %c0_7] : memref<128x128xf32, #tpu.memory_space<vmem>>, vector<128x128xf32>
    %cst_8 = arith.constant dense<0.000000e+00> : vector<8x128xf32>
    %9 = tpu.matmul %7, %8, %cst_8 {dimension_numbers = #tpu.dot_dimension_numbers<[1], [0], [0], [1], [0, 0, 1, 1], [], []>} : vector<8x128xf32>, vector<128x128xf32>, vector<8x128xf32> -> vector<8x128xf32>
    %c0_9 = arith.constant 0 : index
    %c0_10 = arith.constant 0 : index
    %10 = vector.load %arg5[%c0_9, %c0_10] : memref<1x128xf32, #tpu.memory_space<vmem>>, vector<1x128xf32>
    %11 = vector.broadcast %10 : vector<1x128xf32> to vector<8x128xf32>
    %12 = arith.addf %9, %11 : vector<8x128xf32>
    %cst_11 = arith.constant 0.000000e+00 : f32
    %13 = vector.broadcast %cst_11 : f32 to vector<8x128xf32>
    %14 = arith.maximumf %12, %13 : vector<8x128xf32>
    %c0_12 = arith.constant 0 : index
    %c0_13 = arith.constant 0 : index
    %15 = vector.load %arg6[%c0_12, %c0_13] : memref<128x128xf32, #tpu.memory_space<vmem>>, vector<128x128xf32>
    %cst_14 = arith.constant dense<0.000000e+00> : vector<8x128xf32>
    %16 = tpu.matmul %14, %15, %cst_14 {dimension_numbers = #tpu.dot_dimension_numbers<[1], [0], [0], [1], [0, 0, 1, 1], [], []>} : vector<8x128xf32>, vector<128x128xf32>, vector<8x128xf32> -> vector<8x128xf32>
    %c0_15 = arith.constant 0 : index
    %c0_16 = arith.constant 0 : index
    %17 = vector.load %arg7[%c0_15, %c0_16] : memref<1x128xf32, #tpu.memory_space<vmem>>, vector<1x128xf32>
    %18 = vector.broadcast %17 : vector<1x128xf32> to vector<8x128xf32>
    %19 = arith.addf %16, %18 : vector<8x128xf32>
    %cst_17 = arith.constant dense<0xFF800000> : vector<8xf32>
    %20 = vector.multi_reduction <maximumf>, %19, %cst_17 [1] : vector<8x128xf32> to vector<8xf32>
    %21 = vector.shape_cast %20 : vector<8xf32> to vector<8x1xf32>
    %22 = vector.broadcast %21 : vector<8x1xf32> to vector<8x128xf32>
    %23 = arith.subf %19, %22 : vector<8x128xf32>
    %24 = math.exp %23 : vector<8x128xf32>
    %cst_18 = arith.constant dense<0.000000e+00> : vector<8xf32>
    %25 = vector.multi_reduction <add>, %24, %cst_18 [1] : vector<8x128xf32> to vector<8xf32>
    %26 = vector.shape_cast %25 : vector<8xf32> to vector<8x1xf32>
    %27 = math.log %26 : vector<8x1xf32>
    %28 = vector.broadcast %27 : vector<8x1xf32> to vector<8x128xf32>
    %29 = arith.subf %23, %28 : vector<8x128xf32>
    %c0_19 = arith.constant 0 : index
    %c0_20 = arith.constant 0 : index
    %30 = vector.load %arg8[%c0_19, %c0_20] : memref<8x128xf32, #tpu.memory_space<vmem>>, vector<8x128xf32>
    tpu.vector_store %arg8[%c0_19, %c0_20], %29 {strides = array<i32>} : memref<8x128xf32, #tpu.memory_space<vmem>>, vector<8x128xf32>,
    return
  }
  func.func @transform_0(%arg0: i32) -> (i32, i32) {
    %c0_i32 = arith.constant 0 : i32
    %c0_i32_0 = arith.constant 0 : i32
    return %arg0, %c0_i32 : i32, i32
  }
  func.func @transform_1(%arg0: i32) -> (i32, i32) {
    %c0_i32 = arith.constant 0 : i32
    %c0_i32_0 = arith.constant 0 : i32
    %c0_i32_1 = arith.constant 0 : i32
    return %c0_i32, %c0_i32_0 : i32, i32
  }
  func.func @transform_2(%arg0: i32) -> (i32, i32) {
    %c0_i32 = arith.constant 0 : i32
    %c0_i32_0 = arith.constant 0 : i32
    %c0_i32_1 = arith.constant 0 : i32
    return %c0_i32, %c0_i32_0 : i32, i32
  }
  func.func @transform_3(%arg0: i32) -> (i32, i32) {
    %c0_i32 = arith.constant 0 : i32
    %c0_i32_0 = arith.constant 0 : i32
    %c0_i32_1 = arith.constant 0 : i32
    return %c0_i32, %c0_i32_0 : i32, i32
  }
  func.func @transform_4(%arg0: i32) -> (i32, i32) {
    %c0_i32 = arith.constant 0 : i32
    %c0_i32_0 = arith.constant 0 : i32
    %c0_i32_1 = arith.constant 0 : i32
    return %c0_i32, %c0_i32_0 : i32, i32
  }
  func.func @transform_5(%arg0: i32) -> (i32, i32) {
    %c0_i32 = arith.constant 0 : i32
    %c0_i32_0 = arith.constant 0 : i32
    %c0_i32_1 = arith.constant 0 : i32
    return %c0_i32, %c0_i32_0 : i32, i32
  }
  func.func @transform_6(%arg0: i32) -> (i32, i32) {
    %c0_i32 = arith.constant 0 : i32
    %c0_i32_0 = arith.constant 0 : i32
    %c0_i32_1 = arith.constant 0 : i32
    return %c0_i32, %c0_i32_0 : i32, i32
  }
  func.func @transform_7(%arg0: i32) -> (i32, i32) {
    %c0_i32 = arith.constant 0 : i32
    %c0_i32_0 = arith.constant 0 : i32
    return %arg0, %c0_i32 : i32, i32
  }
}

</mosaic_0001>

<bundles_post_ra>
// kernel: densenet_forward.1
= control target key start
LH: loop header
LB: loop body
LE: loop exit
PB: predicated region body
PF: predicated region fallthrough
CT: control target
= control target key end

     0   :  { %12 = vsyncpa [#allocation3], 0  ;;  %s1560_s0 = inlined_call_operand.hbm [shape: f32[8,896], index: 0, kind: input, shape index: {}]   ;;  %s1561_s1 = inlined_call_operand.hbm [shape: f32[896,128], index: 1, kind: input, shape index: {}]   ;;  %s1562_s2 = inlined_call_operand.hbm [shape: f32[1,128], index: 2, kind: input, shape index: {}]   ;;  %s1563_s3 = inlined_call_operand.hbm [shape: f32[128,128], index: 3, kind: input, shape index: {}]   ;;  %s1564_s4 = inlined_call_operand.hbm [shape: f32[1,128], index: 4, kind: input, shape index: {}]   ;;  %s1565_s5 = inlined_call_operand.hbm [shape: f32[128,128], index: 5, kind: input, shape index: {}]   ;;  %s1566_s6 = inlined_call_operand.hbm [shape: f32[1,128], index: 6, kind: input, shape index: {}]   ;;  %s1567_s7 = inlined_call_operand.hbm [shape: f32[8,128], index: 7, kind: output, shape index: {}]  }
   0x1   :  { %13 = vsyncpa [#allocation6], 0 }
   0x2   :  { %14 = vsyncpa [#allocation9], 0 }
   0x3   :  { %15 = vsyncpa [#allocation12], 0 }
   0x4   :  { %16 = vsyncpa [#allocation4], 0  ;;  %s1372_s24 = smov [#allocation5]   ;;  %s1186_s28 = scalar_lea.hbm %s1561_s1, 14336 }
   0x5   :  { %s32_s25 = sshll.u32 %s1372_s24, 4  ;;  %p1187_p0 = scmp.ne.s32.totalorder %s1561_s1, %s1186_s28  ;;  %s33_s25 = int_to_ptr.vmem [resolvable:$true] %s32_s25 }
   0x6   :  { %p1190_p1 = scmp.lt.u32.totalorder %s1186_s28, %s1561_s1 }
   0x8   :  { %p1192_p2 = pnand %p1190_p1, %p1187_p0 }
   0xa   :  { %1195 = shalt.err (!%p1192_p2)
}
   0xb   :  { %s1196_s10 = scalar_lea.vmem %s33_s25, 14336  ;;  %p1201_p4 = scmp.lt.s32.totalorder %s33_s25, %s33_s25 }
   0xc   :  { %p1197_p3 = scmp.ne.s32.totalorder %s33_s25, %s1196_s10  ;;  %p1202_p5 = scmp.lt.s32.totalorder %s1196_s10, %s1196_s10 }
   0xe   :  { %p1203_p6 = por %p1202_p5, %p1201_p4 }
  0x10   :  { %p1204_p7 = pnand %p1203_p6, %p1197_p3 }
  0x12   :  { %1207 = shalt.err (!%p1204_p7)
}
  0x13   :  { %s1373_s11 = smov 128   ;;  %s1374_s12 = smov 8  }
  0x14   :  { %38 = dma.hbm_to_vmem [thread:$0]  %s1561_s1, 14336, %s33_s25, [#allocation6], %s1373_s11, %s1373_s11, %s1374_s12  }
  0x15   :  { %s1375_s15 = smov [#allocation8]   ;;  %s1376_s17 = smov [#allocation11]  }
  0x16   :  { %s54_s16 = sshll.u32 %s1375_s15, 4  ;;  %s76_s18 = sshll.u32 %s1376_s17, 4  ;;  %s55_s16 = int_to_ptr.vmem [resolvable:$true] %s54_s16  ;;  %s77_s18 = int_to_ptr.vmem [resolvable:$true] %s76_s18 }
  0x17   :  { %s1208_s21 = scalar_lea.hbm %s1563_s3, 2048 }
  0x18   :  { %p1209_p8 = scmp.ne.s32.totalorder %s1563_s3, %s1208_s21  ;;  %p1212_p9 = scmp.lt.u32.totalorder %s1208_s21, %s1563_s3 }
  0x1a   :  { %p1214_p10 = pnand %p1212_p9, %p1209_p8 }
  0x1c   :  { %1217 = shalt.err (!%p1214_p10)
}
  0x1d   :  { %s1218_s1 = scalar_lea.vmem %s55_s16, 2048  ;;  %p1223_p12 = scmp.lt.s32.totalorder %s55_s16, %s55_s16 }
  0x1e   :  { %p1219_p11 = scmp.ne.s32.totalorder %s55_s16, %s1218_s1  ;;  %p1224_p13 = scmp.lt.s32.totalorder %s1218_s1, %s1218_s1 }
  0x20   :  { %p1225_p0 = por %p1224_p13, %p1223_p12 }
  0x22   :  { %p1226_p1 = pnand %p1225_p0, %p1219_p11 }
  0x24   :  { %1229 = shalt.err (!%p1226_p1)
}
  0x25   :  { %60 = dma.hbm_to_vmem [thread:$0]  %s1563_s3, 2048, %s55_s16, [#allocation9], %s1373_s11, %s1373_s11, %s1374_s12  }
  0x26   :  { %s1230_s30 = scalar_lea.hbm %s1565_s5, 2048 }
  0x27   :  { %p1231_p2 = scmp.ne.s32.totalorder %s1565_s5, %s1230_s30  ;;  %p1234_p3 = scmp.lt.u32.totalorder %s1230_s30, %s1565_s5 }
  0x29   :  { %p1236_p4 = pnand %p1234_p3, %p1231_p2 }
  0x2b   :  { %1239 = shalt.err (!%p1236_p4)
}
  0x2c   :  { %s1240_s14 = scalar_lea.vmem %s77_s18, 2048  ;;  %p1245_p6 = scmp.lt.s32.totalorder %s77_s18, %s77_s18 }
  0x2d   :  { %p1241_p5 = scmp.ne.s32.totalorder %s77_s18, %s1240_s14  ;;  %p1246_p7 = scmp.lt.s32.totalorder %s1240_s14, %s1240_s14 }
  0x2f   :  { %p1247_p8 = por %p1246_p7, %p1245_p6 }
  0x31   :  { %p1248_p9 = pnand %p1247_p8, %p1241_p5 }
  0x33   :  { %1251 = shalt.err (!%p1248_p9)
}
  0x34   :  { %82 = dma.hbm_to_vmem [thread:$0]  %s1565_s5, 2048, %s77_s18, [#allocation12], %s1373_s11, %s1373_s11, %s1374_s12  }
  0x35   :  { %s1377_s16 = smov [#allocation2]   ;;  %s1378_s19 = smov [#allocation7]  }
  0x36   :  { %s23_s17 = sshll.u32 %s1377_s16, 4  ;;  %s45_s20 = sshll.u32 %s1378_s19, 4  ;;  %s24_s17 = int_to_ptr.vmem [resolvable:$true] %s23_s17  ;;  %s46_s20 = int_to_ptr.vmem [resolvable:$true] %s45_s20 }
  0x37   :  { %s1252_s23 = scalar_lea.hbm %s1560_s0, 896 }
  0x38   :  { %p1253_p10 = scmp.ne.s32.totalorder %s1560_s0, %s1252_s23  ;;  %p1256_p11 = scmp.lt.u32.totalorder %s1252_s23, %s1560_s0 }
  0x3a   :  { %p1258_p12 = pnand %p1256_p11, %p1253_p10 }
  0x3c   :  { %1261 = shalt.err (!%p1258_p12)
}
  0x3d   :  { %s1262_s5 = scalar_lea.vmem %s24_s17, 896  ;;  %p1267_p0 = scmp.lt.s32.totalorder %s24_s17, %s24_s17 }
  0x3e   :  { %p1263_p13 = scmp.ne.s32.totalorder %s24_s17, %s1262_s5  ;;  %p1268_p1 = scmp.lt.s32.totalorder %s1262_s5, %s1262_s5 }
  0x40   :  { %p1269_p2 = por %p1268_p1, %p1267_p0 }
  0x42   :  { %p1270_p3 = pnand %p1269_p2, %p1263_p13 }
  0x44   :  { %1273 = shalt.err (!%p1270_p3)
}
  0x45   :  { %26 = dma.hbm_to_vmem [thread:$0]  %s1560_s0, 896, %s24_s17, [#allocation3]  }
  0x46   :  { %s1274_s28 = scalar_lea.hbm %s1562_s2, 16 }
  0x47   :  { %p1275_p4 = scmp.ne.s32.totalorder %s1562_s2, %s1274_s28  ;;  %p1278_p5 = scmp.lt.u32.totalorder %s1274_s28, %s1562_s2 }
  0x49   :  { %p1280_p6 = pnand %p1278_p5, %p1275_p4 }
  0x4b   :  { %1283 = shalt.err (!%p1280_p6)
}
  0x4c   :  { %s1284_s10 = scalar_lea.vmem %s46_s20, 16  ;;  %s1288_s13 = scalar_lea.vmem %s46_s20, 32 }
  0x4d   :  { %p1285_p7 = scmp.ne.s32.totalorder %s46_s20, %s1284_s10  ;;  %p1289_p8 = scmp.lt.s32.totalorder %s46_s20, %s46_s20 }
  0x4e   :  { %p1290_p9 = scmp.lt.s32.totalorder %s1288_s13, %s1284_s10 }
  0x50   :  { %p1291_p10 = por %p1290_p9, %p1289_p8 }
  0x52   :  { %p1292_p11 = pnand %p1291_p10, %p1285_p7 }
  0x54   :  { %1295 = shalt.err (!%p1292_p11)
}
  0x55   :  { %48 = dma.hbm_to_vmem [thread:$0]  %s1562_s2, 16, %s46_s20, [#allocation6]  }
  0x56   :  { %s1379_s3 = smov [#allocation10]   ;;  %s1380_s16 = smov [#allocation13]  }
  0x57   :  { %s67_s15 = sshll.u32 %s1379_s3, 4  ;;  %s89_s17 = sshll.u32 %s1380_s16, 4  ;;  %s68_s15 = int_to_ptr.vmem [resolvable:$true] %s67_s15  ;;  %s90_s17 = int_to_ptr.vmem [resolvable:$true] %s89_s17 }
  0x58   :  { %s1296_s22 = scalar_lea.hbm %s1564_s4, 16 }
  0x59   :  { %p1297_p12 = scmp.ne.s32.totalorder %s1564_s4, %s1296_s22  ;;  %p1300_p13 = scmp.lt.u32.totalorder %s1296_s22, %s1564_s4 }
  0x5b   :  { %p1302_p0 = pnand %p1300_p13, %p1297_p12 }
  0x5d   :  { %1305 = shalt.err (!%p1302_p0)
}
  0x5e   :  { %s1306_s2 = scalar_lea.vmem %s68_s15, 16  ;;  %s1310_s20 = scalar_lea.vmem %s68_s15, 32 }
  0x5f   :  { %p1307_p1 = scmp.ne.s32.totalorder %s68_s15, %s1306_s2  ;;  %p1311_p2 = scmp.lt.s32.totalorder %s68_s15, %s68_s15 }
  0x60   :  { %p1312_p3 = scmp.lt.s32.totalorder %s1310_s20, %s1306_s2 }
  0x62   :  { %p1313_p4 = por %p1312_p3, %p1311_p2 }
  0x64   :  { %p1314_p5 = pnand %p1313_p4, %p1307_p1 }
  0x66   :  { %1317 = shalt.err (!%p1314_p5)
}
  0x67   :  { %70 = dma.hbm_to_vmem [thread:$0]  %s1564_s4, 16, %s68_s15, [#allocation9]  }
  0x68   :  { %s1318_s18 = scalar_lea.hbm %s1566_s6, 16 }
  0x69   :  { %p1319_p6 = scmp.ne.s32.totalorder %s1566_s6, %s1318_s18  ;;  %p1322_p7 = scmp.lt.u32.totalorder %s1318_s18, %s1566_s6 }
  0x6b   :  { %p1324_p8 = pnand %p1322_p7, %p1319_p6 }
  0x6d   :  { %1327 = shalt.err (!%p1324_p8)
}
  0x6e   :  { %s1328_s8 = scalar_lea.vmem %s90_s17, 16  ;;  %s1332_s9 = scalar_lea.vmem %s90_s17, 32 }
  0x6f   :  { %p1329_p9 = scmp.ne.s32.totalorder %s90_s17, %s1328_s8  ;;  %p1333_p10 = scmp.lt.s32.totalorder %s90_s17, %s90_s17 }
  0x70   :  { %p1334_p11 = scmp.lt.s32.totalorder %s1332_s9, %s1328_s8 }
  0x72   :  { %p1335_p12 = por %p1334_p11, %p1333_p10 }
  0x74   :  { %p1336_p13 = pnand %p1335_p12, %p1329_p9 }
  0x76   :  { %1339 = shalt.err (!%p1336_p13)
}
  0x77   :  { %92 = dma.hbm_to_vmem [thread:$0]  %s1566_s6, 16, %s90_s17, [#allocation12]  }
  0x78   :  { %1362 = dma.done.wait [#allocation3], 896  }
  0x79   :  { %1363 = vsyncadd [#allocation3], 4294966400 }
  0x7a   :  { %1364 = dma.done.wait [#allocation6], 14352  }
  0x7b   :  { %1365 = vsyncadd [#allocation6], 4294952944 }
  0x7c   :  { %1366 = dma.done.wait [#allocation9], 2064  }
  0x7d   :  { %1367 = vsyncadd [#allocation9], 4294965232 }
  0x7e   :  { %1368 = dma.done.wait [#allocation12], 2064  }
  0x7f   :  { %1369 = vsyncadd [#allocation12], 4294965232  ;;  %v137_v0 = vld [vmem:[#allocation5 + $0x80] sm:$0xff]  ;;  %v138_v1 = vld [vmem:[#allocation5 + $0x88] sm:$0xff]  ;;  %vm1382_vm0 = vmmov 0   ;;  %s1384_s6 = smov [#allocation14]  }
  0x80   :  { %v121_v2 = vld [vmem:[#allocation5] sm:$0xff]  ;;  %v1001_v3 = vpack.c.bf16 %v138_v1, %v137_v0  ;;  %v122_v4 = vld [vmem:[#allocation5 + $0x8] sm:$0xff]  ;;  %v139_v11 = vld [vmem:[#allocation5 + $0x90] sm:$0xff]  ;;  %s725_s13 = sshll.u32 %s1384_s6, 4  ;;  %s726_s13 = int_to_ptr.vmem [resolvable:$true] %s725_s13 }
  0x81   :  { %v169_v5 = vld [vmem:[#allocation5 + $0x180] sm:$0xff]  ;;  %v170_v6 = vld [vmem:[#allocation5 + $0x188] sm:$0xff]  ;;  %v1003_v7 = vpack.c.bf16 %v122_v4, %v121_v2  ;;  %v140_v13 = vld [vmem:[#allocation5 + $0x98] sm:$0xff]  ;;  %s1340_s0 = scalar_lea.vmem %s726_s13, 128  ;;  %p1345_p1 = scmp.lt.s32.totalorder %s726_s13, %s726_s13 }
  0x82   :  { %v1033_v8 = vpack.c.bf16 %v170_v6, %v169_v5  ;;  %v153_v9 = vld [vmem:[#allocation5 + $0x100] sm:$0xff]  ;;  %v154_v10 = vld [vmem:[#allocation5 + $0x108] sm:$0xff]  ;;  %1002 = vmatprep.subr.bf16.mxu0 %v1001_v3  ;;  %v123_v14 = vld [vmem:[#allocation5 + $0x10] sm:$0xff]  ;;  %v1005_v16 = vpack.c.bf16 %v140_v13, %v139_v11  ;;  %p1341_p0 = scmp.ne.s32.totalorder %s726_s13, %s1340_s0  ;;  %p1346_p2 = scmp.lt.s32.totalorder %s1340_s0, %s1340_s0 }
  0x83   :  { %v1035_v12 = vpack.c.bf16 %v154_v10, %v153_v9  ;;  %v124_v15 = vld [vmem:[#allocation5 + $0x18] sm:$0xff]  ;;  %1004 = vmatpush3.bf16.msra.mxu0 %v1003_v7  ;;  %v171_v18 = vld [vmem:[#allocation5 + $0x190] sm:$0xff]  ;;  %v141_v23 = vld [vmem:[#allocation5 + $0xa0] sm:$0xff] }
  0x84   :  { %1034 = vmatprep.subr.bf16.mxu1 %v1033_v8  ;;  %v1007_v17 = vpack.c.bf16 %v124_v15, %v123_v14  ;;  %v172_v19 = vld [vmem:[#allocation5 + $0x198] sm:$0xff]  ;;  %v155_v20 = vld [vmem:[#allocation5 + $0x110] sm:$0xff]  ;;  %v142_v24 = vld [vmem:[#allocation5 + $0xa8] sm:$0xff]  ;;  %1006 = vmatprep.subr.bf16.mxu0 %v1005_v16  ;;  %p1347_p3 = por %p1346_p2, %p1345_p1 }
  0x85   :  { %1036 = vmatpush3.bf16.msra.mxu1 %v1035_v12  ;;  %v1037_v21 = vpack.c.bf16 %v172_v19, %v171_v18  ;;  %v156_v22 = vld [vmem:[#allocation5 + $0x118] sm:$0xff]  ;;  %v1009_v26 = vpack.c.bf16 %v142_v24, %v141_v23  ;;  %v125_v27 = vld [vmem:[#allocation5 + $0x20] sm:$0xff]  ;;  %v126_v28 = vld [vmem:[#allocation5 + $0x28] sm:$0xff] }
  0x86   :  { %v1039_v25 = vpack.c.bf16 %v156_v22, %v155_v20  ;;  %v173_v29 = vld [vmem:[#allocation5 + $0x1a0] sm:$0xff]  ;;  %v174_v30 = vld [vmem:[#allocation5 + $0x1a8] sm:$0xff]  ;;  %v1011_v33 = vpack.c.bf16 %v126_v28, %v125_v27  ;;  %v143_v35 = vld [vmem:[#allocation5 + $0xb0] sm:$0xff]  ;;  %p1348_p4 = pnand %p1347_p3, %p1341_p0 }
  0x87   :  { %1038 = vmatprep.subr.bf16.mxu1 %v1037_v21  ;;  %v157_v31 = vld [vmem:[#allocation5 + $0x120] sm:$0xff]  ;;  %v158_v32 = vld [vmem:[#allocation5 + $0x128] sm:$0xff]  ;;  %1008 = vmatpush3.bf16.msra.mxu0 %v1007_v17  ;;  %v1041_v34 = vpack.c.bf16 %v174_v30, %v173_v29  ;;  %v144_v36 = vld [vmem:[#allocation5 + $0xb8] sm:$0xff] }
  0x88   :  { %v127_v37 = vld [vmem:[#allocation5 + $0x30] sm:$0xff]  ;;  %1010 = vmatprep.subr.bf16.mxu0 %v1009_v26  ;;  %v1043_v38 = vpack.c.bf16 %v158_v32, %v157_v31  ;;  %v1013_v39 = vpack.c.bf16 %v144_v36, %v143_v35  ;;  %v128_v40 = vld [vmem:[#allocation5 + $0x38] sm:$0xff]  ;;  %v145_v46 = vld [vmem:[#allocation5 + $0xc0] sm:$0xff] }
  0x89   :  { %1040 = vmatpush3.bf16.msra.mxu1 %v1039_v25  ;;  %v175_v41 = vld [vmem:[#allocation5 + $0x1b0] sm:$0xff]  ;;  %v176_v42 = vld [vmem:[#allocation5 + $0x1b8] sm:$0xff]  ;;  %v146_v47 = vld [vmem:[#allocation5 + $0xc8] sm:$0xff]  ;;  %v1015_v48 = vpack.c.bf16 %v128_v40, %v127_v37 }
  0x8a   :  { %1042 = vmatprep.subr.bf16.mxu1 %v1041_v34  ;;  %v1045_v43 = vpack.c.bf16 %v176_v42, %v175_v41  ;;  %v159_v44 = vld [vmem:[#allocation5 + $0x130] sm:$0xff]  ;;  %v160_v45 = vld [vmem:[#allocation5 + $0x138] sm:$0xff]  ;;  %v177_v49 = vld [vmem:[#allocation5 + $0x1c0] sm:$0xff]  ;;  %v1017_v52 = vpack.c.bf16 %v146_v47, %v145_v46 }
  0x8b   :  { %1012 = vmatpush3.bf16.msra.mxu0 %v1011_v33  ;;  %v178_v50 = vld [vmem:[#allocation5 + $0x1c8] sm:$0xff]  ;;  %v1047_v51 = vpack.c.bf16 %v160_v45, %v159_v44  ;;  %v129_v53 = vld [vmem:[#allocation5 + $0x40] sm:$0xff]  ;;  %v147_v58 = vld [vmem:[#allocation5 + $0xd0] sm:$0xff] }
  0x8c   :  { %1014 = vmatprep.subr.bf16.mxu0 %v1013_v39  ;;  %v130_v54 = vld [vmem:[#allocation5 + $0x48] sm:$0xff]  ;;  %v161_v55 = vld [vmem:[#allocation5 + $0x140] sm:$0xff]  ;;  %v1049_v56 = vpack.c.bf16 %v178_v50, %v177_v49  ;;  %v148_v59 = vld [vmem:[#allocation5 + $0xd8] sm:$0xff] }
  0x8d   :  { %1044 = vmatpush3.bf16.msra.mxu1 %v1043_v38  ;;  %v162_v57 = vld [vmem:[#allocation5 + $0x148] sm:$0xff]  ;;  %v179_v60 = vld [vmem:[#allocation5 + $0x1d0] sm:$0xff]  ;;  %v180_v61 = vld [vmem:[#allocation5 + $0x1d8] sm:$0xff]  ;;  %v1019_v62 = vpack.c.bf16 %v130_v54, %v129_v53  ;;  %v1021_v0 = vpack.c.bf16 %v148_v59, %v147_v58 }
  0x8e   :  { %1046 = vmatprep.subr.bf16.mxu1 %v1045_v43  ;;  %v1051_v63 = vpack.c.bf16 %v162_v57, %v161_v55  ;;  %v131_v1 = vld [vmem:[#allocation5 + $0x50] sm:$0xff]  ;;  %v132_v2 = vld [vmem:[#allocation5 + $0x58] sm:$0xff]  ;;  %v1053_v4 = vpack.c.bf16 %v180_v61, %v179_v60  ;;  %v149_v6 = vld [vmem:[#allocation5 + $0xe0] sm:$0xff] }
  0x8f   :  { %1016 = vmatpush3.bf16.msra.mxu0 %v1015_v48  ;;  %v163_v3 = vld [vmem:[#allocation5 + $0x150] sm:$0xff]  ;;  %v164_v5 = vld [vmem:[#allocation5 + $0x158] sm:$0xff]  ;;  %v150_v7 = vld [vmem:[#allocation5 + $0xe8] sm:$0xff]  ;;  %v1023_v10 = vpack.c.bf16 %v132_v2, %v131_v1  ;;  %v1383_v1 = vmov 0.0  }
  0x90   :  { %1018 = vmatprep.subr.bf16.mxu0 %v1017_v52  ;;  %v181_v8 = vld [vmem:[#allocation5 + $0x1e0] sm:$0xff]  ;;  %v182_v9 = vld [vmem:[#allocation5 + $0x1e8] sm:$0xff]  ;;  %v115_v12 = vld [vmem:[#allocation2 + $0x8] sm:$0xff]  ;;  %v1055_v13 = vpack.c.bf16 %v164_v5, %v163_v3  ;;  %v1025_v14 = vpack.c.bf16 %v150_v7, %v149_v6 }
  0x91   :  { %1048 = vmatpush3.bf16.msra.mxu1 %v1047_v51  ;;  %v133_v11 = vld [vmem:[#allocation5 + $0x60] sm:$0xff]  ;;  %v134_v15 = vld [vmem:[#allocation5 + $0x68] sm:$0xff]  ;;  %v1057_v18 = vpack.c.bf16 %v182_v9, %v181_v8  ;;  %v151_v19 = vld [vmem:[#allocation5 + $0xf0] sm:$0xff]  ;;  %304 = vmatprep.mubr.f32.mxu0 %v115_v12  ;;  %v1381_v51 = vmov 0.0|0.0  }
  0x92   :  { %1050 = vmatprep.subr.bf16.mxu1 %v1049_v56  ;;  %v165_v16 = vld [vmem:[#allocation5 + $0x160] sm:$0xff]  ;;  %v166_v17 = vld [vmem:[#allocation5 + $0x168] sm:$0xff]  ;;  %v152_v20 = vld [vmem:[#allocation5 + $0xf8] sm:$0xff]  ;;  %v1027_v24 = vpack.c.bf16 %v134_v15, %v133_v11 }
  0x93   :  { %1020 = vmatpush3.bf16.msra.mxu0 %v1019_v62  ;;  %v117_v21 = vld [vmem:[#allocation2 + $0x18] sm:$0xff]  ;;  %v183_v22 = vld [vmem:[#allocation5 + $0x1f0] sm:$0xff]  ;;  %v184_v23 = vld [vmem:[#allocation5 + $0x1f8] sm:$0xff]  ;;  %v1059_v25 = vpack.c.bf16 %v166_v17, %v165_v16  ;;  %v1029_v26 = vpack.c.bf16 %v152_v20, %v151_v19 }
  0x94   :  { %1022 = vmatprep.subr.bf16.mxu0 %v1021_v0  ;;  %374 = vmatprep.mubr.f32.mxu1 %v117_v21  ;;  %v135_v27 = vld [vmem:[#allocation5 + $0x70] sm:$0xff]  ;;  %v136_v28 = vld [vmem:[#allocation5 + $0x78] sm:$0xff]  ;;  %v1061_v30 = vpack.c.bf16 %v184_v23, %v183_v22  ;;  %v201_v32 = vld [vmem:[#allocation5 + $0x280] sm:$0xff] }
  0x95   :  { %1052 = vmatpush3.bf16.msra.mxu1 %v1051_v63  ;;  %v167_v29 = vld [vmem:[#allocation5 + $0x170] sm:$0xff]  ;;  %v168_v31 = vld [vmem:[#allocation5 + $0x178] sm:$0xff]  ;;  %v202_v33 = vld [vmem:[#allocation5 + $0x288] sm:$0xff]  ;;  %v1031_v34 = vpack.c.bf16 %v136_v28, %v135_v27 }
  0x96   :  { %1054 = vmatprep.subr.bf16.mxu1 %v1053_v4  ;;  %v1063_v35 = vpack.c.bf16 %v168_v31, %v167_v29  ;;  %v1065_v36 = vpack.c.bf16 %v202_v33, %v201_v32  ;;  %v185_v37 = vld [vmem:[#allocation5 + $0x200] sm:$0xff]  ;;  %v186_v38 = vld [vmem:[#allocation5 + $0x208] sm:$0xff]  ;;  %v203_v39 = vld [vmem:[#allocation5 + $0x290] sm:$0xff] }
  0x97   :  { %1024 = vmatpush3.bf16.msra.mxu0 %v1023_v10  ;;  %v204_v40 = vld [vmem:[#allocation5 + $0x298] sm:$0xff]  ;;  %v217_v41 = vld [vmem:[#allocation5 + $0x300] sm:$0xff]  ;;  %v218_v42 = vld [vmem:[#allocation5 + $0x308] sm:$0xff]  ;;  %v1067_v44 = vpack.c.bf16 %v186_v38, %v185_v37 }
  0x98   :  { %1026 = vmatprep.subr.bf16.mxu0 %v1025_v14  ;;  %v114_v43 = vld [vmem:[#allocation2] sm:$0xff]  ;;  %v116_v45 = vld [vmem:[#allocation2 + $0x10] sm:$0xff]  ;;  %v1069_v46 = vpack.c.bf16 %v204_v40, %v203_v39  ;;  %v187_v47 = vld [vmem:[#allocation5 + $0x210] sm:$0xff]  ;;  %v1098_v49 = vpack.c.bf16 %v218_v42, %v217_v41 }
  0x99   :  { %1056 = vmatpush3.bf16.msra.mxu1 %v1055_v13  ;;  %v188_v48 = vld [vmem:[#allocation5 + $0x218] sm:$0xff]  ;;  %v205_v50 = vld [vmem:[#allocation5 + $0x2a0] sm:$0xff]  ;;  %v206_v52 = vld [vmem:[#allocation5 + $0x2a8] sm:$0xff] }
  0x9a   :  { %1058 = vmatprep.subr.bf16.mxu1 %v1057_v18  ;;  %v219_v53 = vld [vmem:[#allocation5 + $0x310] sm:$0xff]  ;;  %v220_v54 = vld [vmem:[#allocation5 + $0x318] sm:$0xff]  ;;  %v1071_v55 = vpack.c.bf16 %v188_v48, %v187_v47  ;;  %v189_v56 = vld [vmem:[#allocation5 + $0x220] sm:$0xff]  ;;  %v1073_v57 = vpack.c.bf16 %v206_v52, %v205_v50 }
  0x9b   :  { %1028 = vmatpush3.bf16.msra.mxu0 %v1027_v24  ;;  %v190_v58 = vld [vmem:[#allocation5 + $0x228] sm:$0xff]  ;;  %v1101_v59 = vpack.c.bf16 %v220_v54, %v219_v53  ;;  %v207_v60 = vld [vmem:[#allocation5 + $0x2b0] sm:$0xff]  ;;  %v208_v61 = vld [vmem:[#allocation5 + $0x2b8] sm:$0xff] }
  0x9c   :  { %1030 = vmatprep.subr.bf16.mxu0 %v1029_v26  ;;  %v221_v62 = vld [vmem:[#allocation5 + $0x320] sm:$0xff]  ;;  %v222_v63 = vld [vmem:[#allocation5 + $0x328] sm:$0xff]  ;;  %v119_v0 = vld [vmem:[#allocation2 + $0x28] sm:$0xff]  ;;  %v1075_v2 = vpack.c.bf16 %v190_v58, %v189_v56  ;;  %v1077_v3 = vpack.c.bf16 %v208_v61, %v207_v60 }
  0x9d   :  { %1060 = vmatpush3.bf16.msra.mxu1 %v1059_v25  ;;  %v191_v4 = vld [vmem:[#allocation5 + $0x230] sm:$0xff]  ;;  %v192_v5 = vld [vmem:[#allocation5 + $0x238] sm:$0xff]  ;;  %v1104_v6 = vpack.c.bf16 %v222_v63, %v221_v62  ;;  %v209_v7 = vld [vmem:[#allocation5 + $0x2c0] sm:$0xff] }
  0x9e   :  { %1062 = vmatprep.subr.bf16.mxu1 %v1061_v30  ;;  %v210_v8 = vld [vmem:[#allocation5 + $0x2c8] sm:$0xff]  ;;  %v223_v9 = vld [vmem:[#allocation5 + $0x330] sm:$0xff]  ;;  %v224_v10 = vld [vmem:[#allocation5 + $0x338] sm:$0xff]  ;;  %v1079_v11 = vpack.c.bf16 %v192_v5, %v191_v4 }
  0x9f   :  { %1032 = vmatpush3.bf16.msra.mxu0 %v1031_v34  ;;  %v1081_v12 = vpack.c.bf16 %v210_v8, %v209_v7  ;;  %v193_v13 = vld [vmem:[#allocation5 + $0x240] sm:$0xff]  ;;  %v194_v14 = vld [vmem:[#allocation5 + $0x248] sm:$0xff]  ;;  %v1107_v15 = vpack.c.bf16 %v224_v10, %v223_v9  ;;  %v211_v16 = vld [vmem:[#allocation5 + $0x2d0] sm:$0xff] }
  0xa0   :  { %1066 = vmatprep.subr.bf16.mxu0 %v1065_v36  ;;  %v212_v17 = vld [vmem:[#allocation5 + $0x2d8] sm:$0xff]  ;;  %v225_v18 = vld [vmem:[#allocation5 + $0x340] sm:$0xff]  ;;  %v226_v19 = vld [vmem:[#allocation5 + $0x348] sm:$0xff]  ;;  %v1083_v20 = vpack.c.bf16 %v194_v14, %v193_v13 }
  0xa1   :  { %1064 = vmatpush3.bf16.msra.mxu1 %v1063_v35  ;;  %v1085_v21 = vpack.c.bf16 %v212_v17, %v211_v16  ;;  %v195_v22 = vld [vmem:[#allocation5 + $0x250] sm:$0xff]  ;;  %v196_v23 = vld [vmem:[#allocation5 + $0x258] sm:$0xff]  ;;  %v1110_v24 = vpack.c.bf16 %v226_v19, %v225_v18  ;;  %v213_v25 = vld [vmem:[#allocation5 + $0x2e0] sm:$0xff] }
  0xa2   :  { %1097 = vmatprep.subr.bf16.mxu1 %v1381_v51  ;;  %305 = vmatmul.mubr.f32.vlgmr.msra.gmra.mrb[0].mxu0 %v114_v43  ;;  %v214_v26 = vld [vmem:[#allocation5 + $0x2e8] sm:$0xff]  ;;  %v227_v27 = vld [vmem:[#allocation5 + $0x350] sm:$0xff]  ;;  %v228_v28 = vld [vmem:[#allocation5 + $0x358] sm:$0xff]  ;;  %v1087_v29 = vpack.c.bf16 %v196_v23, %v195_v22 }
  0xa3   :  { %1068 = vmatpush3.bf16.msra.mxu0 %v1067_v44  ;;  %444 = vmatprep.mubr.f32.mxu0 %v119_v0  ;;  %v1089_v30 = vpack.c.bf16 %v214_v26, %v213_v25  ;;  %v197_v31 = vld [vmem:[#allocation5 + $0x260] sm:$0xff]  ;;  %v198_v32 = vld [vmem:[#allocation5 + $0x268] sm:$0xff]  ;;  %v1113_v33 = vpack.c.bf16 %v228_v28, %v227_v27  ;;  %v215_v34 = vld [vmem:[#allocation5 + $0x2f0] sm:$0xff] }
  0xa4   :  { %375 = vmatmul.mubr.f32.vlgmr.msra.gmra.mrb[0].mxu1 %v116_v45  ;;  %1070 = vmatprep.subr.bf16.mxu0 %v1069_v46  ;;  %v216_v35 = vld [vmem:[#allocation5 + $0x2f8] sm:$0xff]  ;;  %v229_v36 = vld [vmem:[#allocation5 + $0x360] sm:$0xff]  ;;  %v230_v37 = vld [vmem:[#allocation5 + $0x368] sm:$0xff]  ;;  %v1091_v38 = vpack.c.bf16 %v198_v32, %v197_v31 }
  0xa5   :  { %1099 = vmatpush3.bf16.msra.mxu1 %v1098_v49  ;;  %928 = vmatprep.mubr.msk.f32.mxu1 %vm1382_vm0, %v1383_v1  ;;  %v1093_v39 = vpack.c.bf16 %v216_v35, %v215_v34  ;;  %v199_v40 = vld [vmem:[#allocation5 + $0x270] sm:$0xff]  ;;  %v200_v41 = vld [vmem:[#allocation5 + $0x278] sm:$0xff]  ;;  %v1116_v42 = vpack.c.bf16 %v230_v37, %v229_v36  ;;  %v118_v47 = vld [vmem:[#allocation2 + $0x20] sm:$0xff] }
  0xa6   :  { %1100 = vmatprep.subr.bf16.mxu1 %v1381_v51  ;;  %v231_v43 = vld [vmem:[#allocation5 + $0x370] sm:$0xff]  ;;  %v232_v44 = vld [vmem:[#allocation5 + $0x378] sm:$0xff]  ;;  %v1095_v45 = vpack.c.bf16 %v200_v41, %v199_v40  ;;  %v521_v49 = vld [vmem:[#allocation8] sm:$0xff] }
  0xa7   :  { %1072 = vmatpush3.bf16.msra.mxu0 %v1071_v55  ;;  %v1119_v46 = vpack.c.bf16 %v232_v44, %v231_v43  ;;  %v120_v48 = vld [vmem:[#allocation2 + $0x30] sm:$0xff]  ;;  %v522_v50 = vld [vmem:[#allocation8 + $0x8] sm:$0xff]  ;;  %v525_v56 = vld [vmem:[#allocation8 + $0x20] sm:$0xff] }
  0xa8   :  { %1074 = vmatprep.subr.bf16.mxu0 %v1073_v57  ;;  %v523_v52 = vld [vmem:[#allocation8 + $0x10] sm:$0xff]  ;;  %v1122_v53 = vpack.c.bf16 %v522_v50, %v521_v49  ;;  %v524_v54 = vld [vmem:[#allocation8 + $0x18] sm:$0xff]  ;;  %v526_v57 = vld [vmem:[#allocation8 + $0x28] sm:$0xff] }
  0xa9   :  { %1102 = vmatpush3.bf16.msra.mxu1 %v1101_v59  ;;  %v1125_v55 = vpack.c.bf16 %v524_v54, %v523_v52  ;;  %v1128_v58 = vpack.c.bf16 %v526_v57, %v525_v56  ;;  %v527_v59 = vld [vmem:[#allocation8 + $0x30] sm:$0xff]  ;;  %v528_v60 = vld [vmem:[#allocation8 + $0x38] sm:$0xff]  ;;  %v529_v62 = vld [vmem:[#allocation8 + $0x40] sm:$0xff] }
  0xaa   :  { %1103 = vmatprep.subr.bf16.mxu1 %v1381_v51  ;;  %v1131_v61 = vpack.c.bf16 %v528_v60, %v527_v59  ;;  %v530_v63 = vld [vmem:[#allocation8 + $0x48] sm:$0xff]  ;;  %v533_v4 = vld [vmem:[#allocation8 + $0x60] sm:$0xff]  ;;  %v535_v7 = vld [vmem:[#allocation8 + $0x70] sm:$0xff] }
  0xab   :  { %1076 = vmatpush3.bf16.msra.mxu0 %v1075_v2  ;;  %v1134_v0 = vpack.c.bf16 %v530_v63, %v529_v62  ;;  %v532_v2 = vld [vmem:[#allocation8 + $0x58] sm:$0xff]  ;;  %v534_v5 = vld [vmem:[#allocation8 + $0x68] sm:$0xff]  ;;  %v738_v50 = vld [vmem:[#allocation10] ss:$0 sm:$0xff] }
  0xac   :  { %1078 = vmatprep.subr.bf16.mxu0 %v1077_v3  ;;  %v536_v8 = vld [vmem:[#allocation8 + $0x78] sm:$0xff]  ;;  %v615_v10 = vld [vmem:[#allocation11] sm:$0xff]  ;;  %v620_v17 = vld [vmem:[#allocation11 + $0x28] sm:$0xff] }
  0xad   :  { %1105 = vmatpush3.bf16.msra.mxu1 %v1104_v6  ;;  %v1140_v6 = vpack.c.bf16 %v534_v5, %v533_v4  ;;  %v1143_v9 = vpack.c.bf16 %v536_v8, %v535_v7  ;;  %v618_v14 = vld [vmem:[#allocation11 + $0x18] sm:$0xff]  ;;  %v619_v16 = vld [vmem:[#allocation11 + $0x20] sm:$0xff]  ;;  %v621_v19 = vld [vmem:[#allocation11 + $0x30] sm:$0xff] }
  0xae   :  { %1106 = vmatprep.subr.bf16.mxu1 %v1381_v51  ;;  %v1152_v18 = vpack.c.bf16 %v620_v17, %v619_v16  ;;  %v623_v22 = vld [vmem:[#allocation11 + $0x40] sm:$0xff]  ;;  %v624_v23 = vld [vmem:[#allocation11 + $0x48] sm:$0xff]  ;;  %v625_v25 = vld [vmem:[#allocation11 + $0x50] sm:$0xff] }
  0xaf   :  { %1080 = vmatpush3.bf16.msra.mxu0 %v1079_v11  ;;  %v616_v11 = vld [vmem:[#allocation11 + $0x8] sm:$0xff]  ;;  %v626_v26 = vld [vmem:[#allocation11 + $0x58] sm:$0xff]  ;;  %v627_v28 = vld [vmem:[#allocation11 + $0x60] sm:$0xff] }
  0xb0   :  { %1082 = vmatprep.subr.bf16.mxu0 %v1081_v12  ;;  %v617_v12 = vld [vmem:[#allocation11 + $0x10] sm:$0xff]  ;;  %v1146_v13 = vpack.c.bf16 %v616_v11, %v615_v10  ;;  %v1161_v27 = vpack.c.bf16 %v626_v26, %v625_v25  ;;  %v737_v32 = vld [vmem:[#allocation7] ss:$0 sm:$0xff]  ;;  %v739_v56 = vld [vmem:[#allocation13] ss:$0 sm:$0xff] }
  0xb1   :  { %1108 = vmatpush3.bf16.msra.mxu1 %v1107_v15  ;;  %v1149_v15 = vpack.c.bf16 %v618_v14, %v617_v12 }
  0xb2   :  { %1109 = vmatprep.subr.bf16.mxu1 %v1381_v51 }
  0xb3   :  { %1084 = vmatpush3.bf16.msra.mxu0 %v1083_v20  ;;  %v622_v20 = vld [vmem:[#allocation11 + $0x38] sm:$0xff] }
  0xb4   :  { %1086 = vmatprep.subr.bf16.mxu0 %v1085_v21  ;;  %v1155_v21 = vpack.c.bf16 %v622_v20, %v621_v19 }
  0xb5   :  { %1111 = vmatpush3.bf16.msra.mxu1 %v1110_v24  ;;  %v1158_v24 = vpack.c.bf16 %v624_v23, %v623_v22 }
  0xb6   :  { %1112 = vmatprep.subr.bf16.mxu1 %v1381_v51 }
  0xb7   :  { %1088 = vmatpush3.bf16.msra.mxu0 %v1087_v29  ;;  %v628_v29 = vld [vmem:[#allocation11 + $0x68] sm:$0xff] }
  0xb8   :  { %1090 = vmatprep.subr.bf16.mxu0 %v1089_v30  ;;  %v1164_v30 = vpack.c.bf16 %v628_v29, %v627_v28 }
  0xb9   :  { %1114 = vmatpush3.bf16.msra.mxu1 %v1113_v33 }
  0xba   :  { %1115 = vmatprep.subr.bf16.mxu1 %v1381_v51 }
  0xbb   :  { %1092 = vmatpush3.bf16.msra.mxu0 %v1091_v38 }
  0xbc   :  { %1094 = vmatprep.subr.bf16.mxu0 %v1093_v39 }
  0xbd   :  { %1117 = vmatpush3.bf16.msra.mxu1 %v1116_v42 }
  0xbe   :  { %1118 = vmatprep.subr.bf16.mxu1 %v1381_v51 }
  0xbf   :  { %1096 = vmatpush3.bf16.msra.mxu0 %v1095_v45 }
  0xc0   :  { %1121 = vmatprep.subr.bf16.mxu0 %v1381_v51 }
  0xc1   :  { %1120 = vmatpush3.bf16.msra.mxu1 %v1119_v46 }
  0xc2   :  { %1145 = vmatprep.subr.bf16.mxu1 %v1381_v51  ;;  %445 = vmatmul.mubr.f32.vlgmr.msra.gmra.mrb[2].mxu0 %v118_v47 }
  0xc3   :  { %963 = vmatprep.mubr.msk.f32.mxu0 %vm1382_vm0, %v1383_v1  ;;  %1123 = vmatpush3.bf16.msra.mxu0 %v1122_v53 }
  0xc4   :  { %929 = vmatmul.mubr.f32.vlgmr.msra.gmra.mrb[2].mxu1 %v120_v48  ;;  %1124 = vmatprep.subr.bf16.mxu0 %v1381_v51  ;;  %v629_v48 = vld [vmem:[#allocation11 + $0x70] sm:$0xff] }
  0xc5   :  { %998 = vmatprep.mubr.msk.f32.mxu1 %vm1382_vm0, %v1383_v1  ;;  %v531_v1 = vld [vmem:[#allocation8 + $0x50] sm:$0xff]  ;;  %1147 = vmatpush3.bf16.msra.mxu1 %v1146_v13 }
  0xc6   :  { %v1137_v3 = vpack.c.bf16 %v532_v2, %v531_v1  ;;  %1148 = vmatprep.subr.bf16.mxu1 %v1381_v51 }
  0xc7   :  { %1126 = vmatpush3.bf16.msra.mxu0 %v1125_v55 }
  0xc8   :  { %1127 = vmatprep.subr.bf16.mxu0 %v1381_v51 }
  0xc9   :  { %1150 = vmatpush3.bf16.msra.mxu1 %v1149_v15 }
  0xca   :  { %1151 = vmatprep.subr.bf16.mxu1 %v1381_v51 }
  0xcb   :  { %1129 = vmatpush3.bf16.msra.mxu0 %v1128_v58 }
  0xcc   :  { %1130 = vmatprep.subr.bf16.mxu0 %v1381_v51 }
  0xcd   :  { %1153 = vmatpush3.bf16.msra.mxu1 %v1152_v18 }
  0xce   :  { %1154 = vmatprep.subr.bf16.mxu1 %v1381_v51 }
  0xcf   :  { %1132 = vmatpush3.bf16.msra.mxu0 %v1131_v61 }
  0xd0   :  { %1133 = vmatprep.subr.bf16.mxu0 %v1381_v51 }
  0xd1   :  { %1156 = vmatpush3.bf16.msra.mxu1 %v1155_v21 }
  0xd2   :  { %1157 = vmatprep.subr.bf16.mxu1 %v1381_v51 }
  0xd3   :  { %1135 = vmatpush3.bf16.msra.mxu0 %v1134_v0 }
  0xd4   :  { %1136 = vmatprep.subr.bf16.mxu0 %v1381_v51 }
  0xd5   :  { %1159 = vmatpush3.bf16.msra.mxu1 %v1158_v24 }
  0xd6   :  { %1160 = vmatprep.subr.bf16.mxu1 %v1381_v51 }
  0xd7   :  { %1138 = vmatpush3.bf16.msra.mxu0 %v1137_v3 }
  0xd8   :  { %1139 = vmatprep.subr.bf16.mxu0 %v1381_v51 }
  0xd9   :  { %1162 = vmatpush3.bf16.msra.mxu1 %v1161_v27 }
  0xda   :  { %1163 = vmatprep.subr.bf16.mxu1 %v1381_v51 }
  0xdb   :  { %1141 = vmatpush3.bf16.msra.mxu0 %v1140_v6 }
  0xdc   :  { %1142 = vmatprep.subr.bf16.mxu0 %v1381_v51 }
  0xdd   :  { %1165 = vmatpush3.bf16.msra.mxu1 %v1164_v30 }
  0xde   :  { %1166 = vmatprep.subr.bf16.mxu1 %v1381_v51  ;;  %v630_v51 = vld [vmem:[#allocation11 + $0x78] sm:$0xff] }
  0xdf   :  { %1144 = vmatpush3.bf16.msra.mxu0 %v1143_v9  ;;  %v1167_v49 = vpack.c.bf16 %v630_v51, %v629_v48 }
  0xe1   :  { %1168 = vmatpush3.bf16.msra.mxu1 %v1167_v49 }
 0x175   :  { %v772_v31 = vpop.f32.mrb[0].mxu0 }
 0x176   :  { %v773_v33 = vpop.f32.mrb[1].mxu0 }
 0x177   :  { %v807_v34 = vpop.f32.mrb[0].mxu1  ;;  %v774_v35 = vadd.f32 %v773_v33, %v772_v31 }
 0x178   :  { %v808_v36 = vpop.f32.mrb[1].mxu1 }
 0x179   :  { %v809_v37 = vadd.f32 %v808_v36, %v807_v34  ;;  %v307_v38 = vadd.f32 %v774_v35, %v737_v32 }
 0x17b   :  { %v377_v39 = vadd.f32 %v809_v37, %v307_v38 }
 0x195   :  { %v842_v40 = vpop.f32.mrb[2].mxu0 }
 0x196   :  { %v843_v41 = vpop.f32.mrb[3].mxu0 }
 0x197   :  { %v516_v42 = vpop.f32.mrb[2].mxu1  ;;  %v844_v43 = vadd.f32 %v843_v41, %v842_v40 }
 0x198   :  { %v930_v44 = vpop.f32.mrb[3].mxu1 }
 0x199   :  { %v447_v45 = vadd.f32 %v844_v43, %v377_v39 }
 0x19b   :  { %v517_v46 = vadd.f32 %v516_v42, %v447_v45 }
 0x19d   :  { %v520_v47 = vmax.f32 %v517_v46, 0.0 }
 0x19f   :  { %964 = vmatmul.mubr.f32.vlgmr.msra.gmra.mrb[4].mxu0 %v520_v47 }
 0x272   :  { %v610_v52 = vpop.f32.mrb[4].mxu0 }
 0x273   :  { %v611_v53 = vadd.f32 %v738_v50, %v610_v52  ;;  %v965_v54 = vpop.f32.mrb[5].mxu0 }
 0x275   :  { %v614_v55 = vmax.f32 %v611_v53, 0.0 }
 0x277   :  { %999 = vmatmul.mubr.f32.vlgmr.msra.gmra.mrb[4].mxu1 %v614_v55 }
 0x34a   :  { %v704_v57 = vpop.f32.mrb[4].mxu1 }
 0x34b   :  { %v705_v58 = vadd.f32 %v739_v56, %v704_v57  ;;  %v1000_v59 = vpop.f32.mrb[5].mxu1 }
 0x34d   :  { %708 = vmax.xlane.f32.xlu0 %v705_v58 }
 0x3da   :  { %v709_v60 = vpop.xlane.xlu0 %708 }
 0x3db   :  { %v710_v61 = vsub.f32 %v705_v58, %v709_v60 }
 0x3dd   :  { %v711_v62 = vmul.f32 1.442695, %v710_v61 }
 0x3df   :  { %1182 = vpow2.f32 %v711_v62 }
 0x3e9   :  { %v1183_v63 = vpop.eup %1182 }
 0x3ea   :  { %713 = vadd.xlane.f32.xlu0 %v1183_v63 }
 0x477   :  { %v714_v0 = vpop.xlane.xlu0 %713 }
 0x478   :  { %1184 = vlog2.f32 %v714_v0 }
 0x482   :  { %v1185_v1 = vpop.eup %1184 }
 0x483   :  { %v716_v2 = vmul.f32 0.6931472, %v1185_v1 }
 0x485   :  { %v717_v3 = vsub.f32 %v710_v61, %v716_v2 }
 0x487   :  { %718 = vst [vmem:[#allocation14] sm:$0xff] %v717_v3 }
 0x488   :  { %1351 = shalt.err (!%p1348_p4)
}
 0x489   :  { %s1352_s15 = scalar_lea.hbm %s1567_s7, 128 }
 0x48a   :  { %p1353_p5 = scmp.ne.s32.totalorder %s1567_s7, %s1352_s15  ;;  %p1356_p6 = scmp.lt.u32.totalorder %s1352_s15, %s1567_s7 }
 0x48c   :  { %p1358_p7 = pnand %p1356_p6, %p1353_p5 }
 0x48e   :  { %1361 = shalt.err (!%p1358_p7)
}
 0x48f   :  { %728 = dma.vmem_to_hbm [thread:$0]  %s726_s13, 128, %s1567_s7, [#allocation4]  }
 0x490   :  { %1370 = dma.done.wait [#allocation4], 128  }
 0x491   :  { %1371 = vsyncadd [#allocation4], 4294967168 }
 0x492   :  { %732 = vsyncpa [#allocation3], 1 }
 0x493   :  { %733 = vsyncpa [#allocation6], 1 }
 0x494   :  { %734 = vsyncpa [#allocation9], 1 }
 0x495   :  { %735 = vsyncpa [#allocation12], 1 }
 0x496   :  { %736 = vsyncpa [#allocation4], 1 }

</bundles_post_ra>
